<compile_context>
chip_gen: v6e
topology: v6e:2x2x1
jax: 0.10.0
libtpu: 0.0.40
codegen_flags: <defaults>
</compile_context>

<pallas_src>
import math

import jax
import jax.numpy as jnp
import numpy as np
from jax.experimental import pallas as pl
from jax.experimental.pallas import tpu as pltpu


def _round_up(x, m):
    return ((x + m - 1) // m) * m


def _image_actor_kernel(scal_ref, sums_ref, img_ref, w1_ref, vec_ref, out_ref):
    """Fused ImageActor.forward hot path.

    scal_ref : SMEM (4,)  f32  [1/n_sel, 1/n_unsel, b2[1]-b2[0], pad]
    sums_ref : VMEM (2,E) f32  running sums of selected / unselected encodings
    img_ref  : VMEM (1,E) f32  current image encoding
    w1_ref   : VMEM (3,E,E) f32  W1 split into the three input blocks
    vec_ref  : VMEM (2,E) f32  row0 = b1, row1 = w2[:,1]-w2[:,0]
    out_ref  : VMEM (1,OUT_W) f32 packed, lane-dense output slab:
               [0:3E]   state = [mean_sel | mean_unsel | image]
               [3E]     d  = logit1 - logit0
               [3E+1]   p1 = softmax(logits)[1] = sigmoid(d)
               [3E+2]   greedy action (0.0 / 1.0)
    """
    E = img_ref.shape[1]

    inv_n_sel = scal_ref[0]
    inv_n_unsel = scal_ref[1]
    b2_diff = scal_ref[2]

    # means from running sums (replaces mean over the concatenated history)
    state_a = sums_ref[0:1, :] * inv_n_sel          # [1, E]
    state_b = sums_ref[1:2, :] * inv_n_unsel        # [1, E]
    img = img_ref[...]                              # [1, E]

    b1 = vec_ref[0:1, :]
    w2_diff = vec_ref[1:2, :]

    # Linear(3E, E) without the lane concatenate: three [1,E]@[E,E] blocks.
    h = (jnp.dot(state_a, w1_ref[0], preferred_element_type=jnp.float32)
         + jnp.dot(state_b, w1_ref[1], preferred_element_type=jnp.float32)
         + jnp.dot(img, w1_ref[2], preferred_element_type=jnp.float32)
         + b1)
    h = jnp.maximum(h, 0.0)                         # ReLU

    # Linear(E, 2) + Softmax + argmax collapsed to a logit difference:
    d = jnp.sum(h * w2_diff, axis=-1, keepdims=True) + b2_diff    # [1, 1]
    p1 = 1.0 / (1.0 + jnp.exp(-d))                                # softmax[..,1]
    # strict '>' == torch.max first-index tie-break on [logit0, logit1]
    act = (d > 0.0).astype(jnp.float32)

    # Packed, lane-dense output (single [1, OUT_W] writeback DMA).
    out_ref[...] = jnp.zeros_like(out_ref)
    out_ref[:, 0:E] = state_a
    out_ref[:, E:2 * E] = state_b
    out_ref[:, 2 * E:3 * E] = img
    out_ref[:, 3 * E:3 * E + 1] = d
    out_ref[:, 3 * E + 1:3 * E + 2] = p1
    out_ref[:, 3 * E + 2:3 * E + 3] = act


@jax.jit
def _image_actor_call(scalars, sums, image, w1_blocks, vec_params):
    E = image.shape[1]
    out_w = _round_up(3 * E + 3, 128)
    vmem = pl.BlockSpec(memory_space=pltpu.MemorySpace.VMEM)
    smem = pl.BlockSpec(memory_space=pltpu.MemorySpace.SMEM)
    return pl.pallas_call(
        _image_actor_kernel,
        out_shape=jax.ShapeDtypeStruct((1, out_w), jnp.float32),
        in_specs=[smem, vmem, vmem, vmem, vmem],
        out_specs=vmem,
    )(scalars, sums, image, w1_blocks, vec_params)


class ImageActorPallas:
    """JAX/Pallas port of ImageActor (deterministic in-script init)."""

    def __init__(self, encoding_dim, key):
        self.encoding_dim = E = encoding_dim
        k1, k2, k3, k4 = jax.random.split(key, 4)
        fan1 = 3 * E
        b1_bound = 1.0 / math.sqrt(fan1)
        b2_bound = 1.0 / math.sqrt(E)
        # PyTorch nn.Linear default: U(-1/sqrt(fan_in), 1/sqrt(fan_in));
        # weights stored transposed ([in, out]) so y = x @ W + b.
        w1_full = jax.random.uniform(k1, (fan1, E), jnp.float32, -b1_bound, b1_bound)
        b1 = jax.random.uniform(k2, (1, E), jnp.float32, -b1_bound, b1_bound)
        w2 = jax.random.uniform(k3, (E, 2), jnp.float32, -b2_bound, b2_bound)
        b2 = jax.random.uniform(k4, (1, 2), jnp.float32, -b2_bound, b2_bound)

        # Kernel-side parameter layout (computed ONCE at init).
        self.w1_blocks = w1_full.reshape(3, E, E)                 # [3, E, E]
        w2_diff = (w2[:, 1] - w2[:, 0]).reshape(1, E)
        self.vec_params = jnp.concatenate([b1, w2_diff], axis=0)  # [2, E]
        self.b2_diff = float(b2[0, 1] - b2[0, 0])

        # Original-form weights, kept only for the pure-JAX reference.
        self.w1_full, self.b1, self.w2, self.b2 = w1_full, b1, w2, b2

        # Running-sum replacement for the growing selected/unselected lists.
        # History starts with one zero row in each bucket (as in the original).
        self.sums = jnp.zeros((2, E), jnp.float32)   # row0 = selected, row1 = unselected
        self.n_sel = 1
        self.n_unsel = 1

        # Reference history with the original list semantics (for testing only).
        self._ref_selected = [jnp.zeros((1, E), jnp.float32)]
        self._ref_unselected = [jnp.zeros((1, E), jnp.float32)]

    # ---- Pallas hot path -------------------------------------------------
    def _kernel_out(self, image):
        scalars = jnp.array(
            [1.0 / self.n_sel, 1.0 / self.n_unsel, self.b2_diff, 0.0], jnp.float32)
        return _image_actor_call(scalars, self.sums, image,
                                 self.w1_blocks, self.vec_params)

    # ---- glue reproducing ImageActor.forward / choose_action -------------
    def forward(self, image, need_backward, target, rng=None):
        E = self.encoding_dim
        out = self._kernel_out(image)
        state = out[:, :3 * E]

        if need_backward:
            # Categorical(probs).sample(); softmax([l0,l1]) == softmax([0, l1-l0]),
            # so sample directly from the kernel's logit difference (no log(probs)).
            logits2 = jnp.concatenate(
                [jnp.zeros((1, 1), jnp.float32), out[:, 3 * E:3 * E + 1]], axis=-1)
            action = jax.random.categorical(rng, logits2, axis=-1)     # (1,)
        else:
            action = out[:, 3 * E + 2].astype(jnp.int32)               # (1,)

        if target:
            # zeros(B, 2).scatter_(1, action, 1) -> one-hot; no buffer update.
            return state, jax.nn.one_hot(action, 2, dtype=jnp.float32)

        act = int(action[0])   # host sync mirrors tensor.item() in the original
        if act == 1:
            self.sums = self.sums.at[0].add(image[0])
            self.n_sel += 1
        else:
            self.sums = self.sums.at[1].add(image[0])
            self.n_unsel += 1
        return state, act

    # ---- pure-JAX reference (original list-based semantics) --------------
    def _ref_forward(self, image):
        sel = jnp.concatenate(self._ref_selected, axis=0)
        unsel = jnp.concatenate(self._ref_unselected, axis=0)
        state = jnp.concatenate(
            [jnp.mean(sel, axis=0, keepdims=True),
             jnp.mean(unsel, axis=0, keepdims=True),
             image], axis=-1)
        h = jax.nn.relu(state @ self.w1_full + self.b1)
        probs = jax.nn.softmax(h @ self.w2 + self.b2, axis=-1)
        action = int(jnp.argmax(probs, axis=-1)[0])
        if action == 1:
            self._ref_selected.append(image)
        else:
            self._ref_unselected.append(image)
        return state, probs, action


if __name__ == "__main__":
    E = 32  # encoding_dim
    key = jax.random.PRNGKey(0)
    pkey, ikey, skey = jax.random.split(key, 3)

    actor = ImageActorPallas(E, pkey)
    images = jax.random.normal(ikey, (4, 1, E), jnp.float32)

    for t in range(images.shape[0]):
        # raw kernel output for this step (no state mutation)
        out = jax.block_until_ready(actor._kernel_out(images[t]))

        ref_state, ref_probs, ref_action = actor._ref_forward(images[t])
        state, act = actor.forward(images[t], need_backward=False, target=False)
        state = jax.block_until_ready(state)

        np.testing.assert_allclose(np.asarray(state), np.asarray(ref_state),
                                   rtol=2e-3, atol=2e-3)
        np.testing.assert_allclose(float(out[0, 3 * E + 1]),
                                   float(ref_probs[0, 1]), rtol=2e-3, atol=2e-3)
        assert act == ref_action, (t, act, ref_action)

    # target (one-hot) path
    state, onehot = actor.forward(images[0], need_backward=False, target=True)
    jax.block_until_ready((state, onehot))
    assert onehot.shape == (1, 2)

    # need_backward (Categorical sampling) path
    state, onehot = actor.forward(images[0], need_backward=True, target=True, rng=skey)
    jax.block_until_ready((state, onehot))
    assert onehot.shape == (1, 2)

    print("KERNEL_OK")
</pallas_src>

<mosaic_0001>
module attributes {stable_mosaic.version = 11 : i64} {
  func.func @_image_actor_kernel(%arg0: memref<4xf32, #tpu.memory_space<smem>>, %arg1: memref<2x32xf32, #tpu.memory_space<vmem>>, %arg2: memref<1x32xf32, #tpu.memory_space<vmem>>, %arg3: memref<3x32x32xf32, #tpu.memory_space<vmem>>, %arg4: memref<2x32xf32, #tpu.memory_space<vmem>>, %arg5: memref<1x128xf32, #tpu.memory_space<vmem>>) attributes {dimension_semantics = [], scalar_prefetch = 0 : i64, scratch_operands = 0 : i64, tpu.core_type = #tpu.core_type<tc>} {
    %c0 = arith.constant 0 : index
    %0 = memref.load %arg0[%c0] : memref<4xf32, #tpu.memory_space<smem>>
    %c1 = arith.constant 1 : index
    %1 = memref.load %arg0[%c1] : memref<4xf32, #tpu.memory_space<smem>>
    %c2 = arith.constant 2 : index
    %2 = memref.load %arg0[%c2] : memref<4xf32, #tpu.memory_space<smem>>
    %c0_0 = arith.constant 0 : index
    %c0_1 = arith.constant 0 : index
    %3 = vector.load %arg1[%c0_0, %c0_1] : memref<2x32xf32, #tpu.memory_space<vmem>>, vector<1x32xf32>
    %4 = vector.broadcast %0 : f32 to vector<1x32xf32>
    %5 = arith.mulf %3, %4 : vector<1x32xf32>
    %c1_2 = arith.constant 1 : index
    %c0_3 = arith.constant 0 : index
    %6 = vector.load %arg1[%c1_2, %c0_3] : memref<2x32xf32, #tpu.memory_space<vmem>>, vector<1x32xf32>
    %7 = vector.broadcast %1 : f32 to vector<1x32xf32>
    %8 = arith.mulf %6, %7 : vector<1x32xf32>
    %c0_4 = arith.constant 0 : index
    %c0_5 = arith.constant 0 : index
    %9 = vector.load %arg2[%c0_4, %c0_5] : memref<1x32xf32, #tpu.memory_space<vmem>>, vector<1x32xf32>
    %c0_6 = arith.constant 0 : index
    %c0_7 = arith.constant 0 : index
    %10 = vector.load %arg4[%c0_6, %c0_7] : memref<2x32xf32, #tpu.memory_space<vmem>>, vector<1x32xf32>
    %c1_8 = arith.constant 1 : index
    %c0_9 = arith.constant 0 : index
    %11 = vector.load %arg4[%c1_8, %c0_9] : memref<2x32xf32, #tpu.memory_space<vmem>>, vector<1x32xf32>
    %c0_10 = arith.constant 0 : index
    %c0_11 = arith.constant 0 : index
    %c0_12 = arith.constant 0 : index
    %12 = vector.load %arg3[%c0_10, %c0_11, %c0_12] : memref<3x32x32xf32, #tpu.memory_space<vmem>>, vector<1x32x32xf32>
    %13 = vector.shape_cast %12 : vector<1x32x32xf32> to vector<32x32xf32>
    %cst = arith.constant dense<0.000000e+00> : vector<1x32xf32>
    %14 = tpu.matmul %5, %13, %cst {dimension_numbers = #tpu.dot_dimension_numbers<[1], [0], [0], [1], [0, 0, 1, 1], [], []>} : vector<1x32xf32>, vector<32x32xf32>, vector<1x32xf32> -> vector<1x32xf32>
    %c1_13 = arith.constant 1 : index
    %c0_14 = arith.constant 0 : index
    %c0_15 = arith.constant 0 : index
    %15 = vector.load %arg3[%c1_13, %c0_14, %c0_15] : memref<3x32x32xf32, #tpu.memory_space<vmem>>, vector<1x32x32xf32>
    %16 = vector.shape_cast %15 : vector<1x32x32xf32> to vector<32x32xf32>
    %cst_16 = arith.constant dense<0.000000e+00> : vector<1x32xf32>
    %17 = tpu.matmul %8, %16, %cst_16 {dimension_numbers = #tpu.dot_dimension_numbers<[1], [0], [0], [1], [0, 0, 1, 1], [], []>} : vector<1x32xf32>, vector<32x32xf32>, vector<1x32xf32> -> vector<1x32xf32>
    %18 = arith.addf %14, %17 : vector<1x32xf32>
    %c2_17 = arith.constant 2 : index
    %c0_18 = arith.constant 0 : index
    %c0_19 = arith.constant 0 : index
    %19 = vector.load %arg3[%c2_17, %c0_18, %c0_19] : memref<3x32x32xf32, #tpu.memory_space<vmem>>, vector<1x32x32xf32>
    %20 = vector.shape_cast %19 : vector<1x32x32xf32> to vector<32x32xf32>
    %cst_20 = arith.constant dense<0.000000e+00> : vector<1x32xf32>
    %21 = tpu.matmul %9, %20, %cst_20 {dimension_numbers = #tpu.dot_dimension_numbers<[1], [0], [0], [1], [0, 0, 1, 1], [], []>} : vector<1x32xf32>, vector<32x32xf32>, vector<1x32xf32> -> vector<1x32xf32>
    %22 = arith.addf %18, %21 : vector<1x32xf32>
    %23 = arith.addf %22, %10 : vector<1x32xf32>
    %cst_21 = arith.constant 0.000000e+00 : f32
    %24 = vector.broadcast %cst_21 : f32 to vector<1x32xf32>
    %25 = arith.maximumf %23, %24 : vector<1x32xf32>
    %26 = arith.mulf %25, %11 : vector<1x32xf32>
    %cst_22 = arith.constant dense<0.000000e+00> : vector<1xf32>
    %27 = vector.multi_reduction <add>, %26, %cst_22 [1] : vector<1x32xf32> to vector<1xf32>
    %28 = vector.shape_cast %27 : vector<1xf32> to vector<1x1xf32>
    %29 = vector.broadcast %2 : f32 to vector<1x1xf32>
    %30 = arith.addf %28, %29 : vector<1x1xf32>
    %cst_23 = arith.constant 0.000000e+00 : f32
    %31 = vector.broadcast %cst_23 : f32 to vector<1x1xf32>
    %32 = arith.subf %31, %30 : vector<1x1xf32>
    %33 = math.exp %32 : vector<1x1xf32>
    %cst_24 = arith.constant 1.000000e+00 : f32
    %34 = vector.broadcast %cst_24 : f32 to vector<1x1xf32>
    %35 = arith.addf %34, %33 : vector<1x1xf32>
    %cst_25 = arith.constant 1.000000e+00 : f32
    %36 = vector.broadcast %cst_25 : f32 to vector<1x1xf32>
    %37 = arith.divf %36, %35 : vector<1x1xf32>
    %cst_26 = arith.constant 0.000000e+00 : f32
    %38 = vector.broadcast %cst_26 : f32 to vector<1x1xf32>
    %39 = arith.cmpf ogt, %30, %38 : vector<1x1xf32>
    %40 = arith.extui %39 : vector<1x1xi1> to vector<1x1xi32>
    %41 = arith.sitofp %40 : vector<1x1xi32> to vector<1x1xf32>
    %cst_27 = arith.constant 0.000000e+00 : f32
    %42 = vector.broadcast %cst_27 : f32 to vector<1x128xf32>
    %c0_28 = arith.constant 0 : index
    %c0_29 = arith.constant 0 : index
    %43 = vector.load %arg5[%c0_28, %c0_29] : memref<1x128xf32, #tpu.memory_space<vmem>>, vector<1x128xf32>
    tpu.vector_store %arg5[%c0_28, %c0_29], %42 {strides = array<i32>} : memref<1x128xf32, #tpu.memory_space<vmem>>, vector<1x128xf32>,
    %c0_30 = arith.constant 0 : index
    %c0_31 = arith.constant 0 : index
    %44 = vector.load %arg5[%c0_30, %c0_31] : memref<1x128xf32, #tpu.memory_space<vmem>>, vector<1x32xf32>
    tpu.vector_store %arg5[%c0_30, %c0_31], %5 {strides = array<i32>} : memref<1x128xf32, #tpu.memory_space<vmem>>, vector<1x32xf32>,
    %c0_32 = arith.constant 0 : index
    %c32 = arith.constant 32 : index
    %45 = vector.load %arg5[%c0_32, %c32] : memref<1x128xf32, #tpu.memory_space<vmem>>, vector<1x32xf32>
    tpu.vector_store %arg5[%c0_32, %c32], %8 {strides = array<i32>} : memref<1x128xf32, #tpu.memory_space<vmem>>, vector<1x32xf32>,
    %c0_33 = arith.constant 0 : index
    %c64 = arith.constant 64 : index
    %46 = vector.load %arg5[%c0_33, %c64] : memref<1x128xf32, #tpu.memory_space<vmem>>, vector<1x32xf32>
    tpu.vector_store %arg5[%c0_33, %c64], %9 {strides = array<i32>} : memref<1x128xf32, #tpu.memory_space<vmem>>, vector<1x32xf32>,
    %c0_34 = arith.constant 0 : index
    %c96 = arith.constant 96 : index
    %47 = vector.load %arg5[%c0_34, %c96] : memref<1x128xf32, #tpu.memory_space<vmem>>, vector<1x1xf32>
    tpu.vector_store %arg5[%c0_34, %c96], %30 {strides = array<i32>} : memref<1x128xf32, #tpu.memory_space<vmem>>, vector<1x1xf32>,
    %c0_35 = arith.constant 0 : index
    %c97 = arith.constant 97 : index
    %48 = vector.load %arg5[%c0_35, %c97] : memref<1x128xf32, #tpu.memory_space<vmem>>, vector<1x1xf32>
    tpu.vector_store %arg5[%c0_35, %c97], %37 {strides = array<i32>} : memref<1x128xf32, #tpu.memory_space<vmem>>, vector<1x1xf32>,
    %c0_36 = arith.constant 0 : index
    %c98 = arith.constant 98 : index
    %49 = vector.load %arg5[%c0_36, %c98] : memref<1x128xf32, #tpu.memory_space<vmem>>, vector<1x1xf32>
    tpu.vector_store %arg5[%c0_36, %c98], %41 {strides = array<i32>} : memref<1x128xf32, #tpu.memory_space<vmem>>, vector<1x1xf32>,
    return
  }
}

</mosaic_0001>

<bundles_post_ra>
// kernel: _image_actor_call.1
= control target key start
LH: loop header
LB: loop body
LE: loop exit
PB: predicated region body
PF: predicated region fallthrough
CT: control target
= control target key end

     0   :  { %10 = vsyncpa [#allocation5], 0  ;;  %s592_s0 = inlined_call_operand.hbm [shape: f32[4], index: 0, kind: input, shape index: {}]   ;;  %s593_s1 = inlined_call_operand.hbm [shape: f32[2,32], index: 1, kind: input, shape index: {}]   ;;  %s594_s2 = inlined_call_operand.vmem [shape: f32[1,32], index: 2, kind: input, shape index: {}]   ;;  %s595_s3 = inlined_call_operand.hbm [shape: f32[3,32,32], index: 3, kind: input, shape index: {}]   ;;  %s596_s4 = inlined_call_operand.vmem [shape: f32[2,32], index: 4, kind: input, shape index: {}]   ;;  %s597_s5 = inlined_call_operand.hbm [shape: f32[1,128], index: 5, kind: output, shape index: {}]  }
   0x1   :  { %11 = vsyncpa [#allocation3], 0 }
   0x2   :  { %12 = vsyncpa [#allocation8], 0 }
   0x3   :  { %13 = vsyncpa [#allocation4], 0  ;;  %s506_s18 = smov [#allocation2]   ;;  %s507_s21 = smov [#allocation6]  }
   0x4   :  { %21 = dma.hbm_to_smem %s592_s0, 16, %s506_s18, [#allocation5]  }
   0x5   :  { %s28_s22 = sshll.u32 %s507_s21, 4  ;;  %s508_s23 = smov [#allocation7]   ;;  %s29_s22 = int_to_ptr.vmem [resolvable:$true] %s28_s22 }
   0x6   :  { %s39_s24 = sshll.u32 %s508_s23, 4  ;;  %s446_s25 = scalar_lea.vmem %s29_s22, 32  ;;  %s40_s24 = int_to_ptr.vmem [resolvable:$true] %s39_s24 }
   0x7   :  { %p447_p0 = scmp.ne.s32.totalorder %s29_s22, %s446_s25  ;;  %p451_p1 = scmp.lt.s32.totalorder %s29_s22, %s29_s22 }
   0x8   :  { %p452_p2 = scmp.lt.s32.totalorder %s446_s25, %s446_s25 }
   0xa   :  { %p453_p3 = por %p452_p2, %p451_p1 }
   0xc   :  { %p454_p4 = pnand %p453_p3, %p447_p0 }
   0xe   :  { %457 = shalt.err (!%p454_p4)
}
   0xf   :  { %31 = dma.hbm_to_vmem [thread:$0]  %s593_s1, 32, %s29_s22, [#allocation3]  }
  0x10   :  { %s466_s28 = scalar_lea.vmem %s40_s24, 1536  ;;  %p471_p6 = scmp.lt.s32.totalorder %s40_s24, %s40_s24 }
  0x11   :  { %p467_p5 = scmp.ne.s32.totalorder %s40_s24, %s466_s28  ;;  %p472_p7 = scmp.lt.s32.totalorder %s466_s28, %s466_s28 }
  0x13   :  { %p473_p8 = por %p472_p7, %p471_p6 }
  0x15   :  { %p474_p9 = pnand %p473_p8, %p467_p5 }
  0x17   :  { %477 = shalt.err (!%p474_p9)
}
  0x18   :  { %s509_s0 = smov 128   ;;  %s510_s29 = smov 8  }
  0x19   :  { %45 = dma.hbm_to_vmem [thread:$0]  %s595_s3, 1536, %s40_s24, [#allocation8], %s509_s0, %s509_s0, %s510_s29  }
  0x1a   :  { %498 = dma.done.wait [#allocation5], 16  }
  0x1b   :  { %499 = vsyncadd [#allocation5], 4294967280 }
  0x1c   :  { %500 = dma.done.wait [#allocation3], 32  }
  0x1d   :  { %501 = vsyncadd [#allocation3], 4294967264 }
  0x1e   :  { %502 = dma.done.wait [#allocation8], 1536  }
  0x1f   :  { %503 = vsyncadd [#allocation8], 4294965760 }
  0x20   :  { %57 = sfence }
  0x21   :  { %v78_v0 = vld [vmem:[#allocation7 + $0x38] sm:$0xff]  ;;  %v511_v2 = vmov 0.0   ;;  %v77_v3 = vld [vmem:[#allocation7 + $0x30] sm:$0xff]  ;;  %s362_s1 = sld [smem:[#allocation2 + $0x1]]  ;;  %v76_v5 = vld [vmem:[#allocation7 + $0x28] sm:$0xff]  ;;  %vm512_vm0 = vmmov 0   ;;  %v330_v20 = vlaneseq }
  0x22   :  { %v73_v1 = vld [vmem:[#allocation7 + $0x18] sm:$0xff]  ;;  %383 = vmatprep.subr.mxu0 %v511_v2  ;;  %323 = vst [vmem:[#allocation9] sm:$0x1] %v511_v2  ;;  %394 = vmatprep.subr.mxu1 %v511_v2  ;;  %v72_v4 = vld [vmem:[#allocation7 + $0x10] sm:$0xff]  ;;  %s58_s3 = sld [smem:[#allocation2]]  ;;  %v71_v6 = vld [vmem:[#allocation7 + $0x8] sm:$0xff] }
  0x23   :  { %384 = vmatpush3.msra.mxu0 %v78_v0  ;;  %395 = vmatpush3.msra.mxu1 %v73_v1  ;;  %v75_v7 = vld [vmem:[#allocation7 + $0x20] sm:$0xff]  ;;  %v64_v8 = vld [vmem:[#allocation6 + $0x1] sm:$0x1]  ;;  %v61_v10 = vld [vmem:[#allocation6] sm:$0x1]  ;;  %vm79_vm1 = vcmask 261120  }
  0x24   :  { %385 = vmatprep.subr.mxu0 %v511_v2  ;;  %396 = vmatprep.subr.mxu1 %v511_v2  ;;  %v70_v9 = vld [vmem:[#allocation7] sm:$0xff]  ;;  %v230_v14 = vld [vmem:[#allocation7 + $0x58] sm:$0xff]  ;;  %v229_v16 = vld [vmem:[#allocation7 + $0x50] sm:$0xff]  ;;  %vm308_vm2 = vcmask 253952   ;;  %v331_v21 = vshrl.u32 %v330_v20, 7  ;;  %s513_s9 = smov 64  }
  0x25   :  { %386 = vmatpush3.msra.mxu0 %v77_v3  ;;  %397 = vmatpush3.msra.mxu1 %v72_v4  ;;  %v228_v17 = vld [vmem:[#allocation7 + $0x48] sm:$0xff]  ;;  %v227_v18 = vld [vmem:[#allocation7 + $0x40] sm:$0xff]  ;;  %v67_v19 = vld [vmem:[%s594_s2] sm:$0x1]  ;;  %s514_s13 = smov 32   ;;  %s363_s14 = sld [smem:[#allocation2 + $0x2]] }
  0x26   :  { %387 = vmatprep.subr.mxu0 %v511_v2  ;;  %398 = vmatprep.subr.mxu1 %v511_v2  ;;  %v332_v22 = vsub.s32 0, %v331_v21  ;;  %v68_v29 = vld [vmem:[%s596_s4] sm:$0x1]  ;;  %v69_v34 = vld [vmem:[%s596_s4 + $0x1] sm:$0x1]  ;;  %vm328_vm3 = vcmask 516352  }
  0x27   :  { %388 = vmatpush3.msra.mxu0 %v76_v5  ;;  %399 = vmatpush3.msra.mxu1 %v71_v6  ;;  %v65_v11 = vstv %s362_s1  ;;  %vm337_vm4 = vcmask 778752   ;;  %vm339_vm5 = vcmask 787200   ;;  %s515_s4 = smov [#allocation9]   ;;  %vm341_vm7 = vcmask 795400  }
  0x28   :  { %389 = vmatprep.subr.mxu0 %v511_v2  ;;  %391 = vmatprep.mubr.msk.f32.mxu0 %vm512_vm0, %v511_v2  ;;  %v66_v12 = vmul.f32 %v65_v11, %v64_v8  ;;  %v62_v13 = vstv %s58_s3  ;;  %v333_v23 = vrot.slane %v67_v19, %v332_v22  ;;  %s351_s15 = sshll.u32 %s515_s4, 4  ;;  %vm343_vm8 = vcmask 803600   ;;  %s352_s15 = int_to_ptr.vmem [resolvable:$true] %s351_s15 }
  0x29   :  { %390 = vmatpush3.msra.mxu0 %v75_v7  ;;  %400 = vmatprep.subr.mxu1 %v511_v2  ;;  %v63_v15 = vmul.f32 %v62_v13, %v61_v10  ;;  %s478_s16 = scalar_lea.vmem %s352_s15, 16  ;;  %s482_s17 = scalar_lea.vmem %s352_s15, 32 }
  0x2a   :  { %401 = vmatpush3.msra.mxu1 %v70_v9  ;;  %402 = vmatprep.mubr.msk.f32.mxu1 %vm512_vm0, %v511_v2  ;;  %p479_p10 = scmp.ne.s32.totalorder %s352_s15, %s478_s16  ;;  %p483_p11 = scmp.lt.s32.totalorder %s352_s15, %s352_s15 }
  0x2b   :  { %392 = vmatmul.mubr.msk.f32.vlgmr.msra.gmra.mxu0 %vm79_vm1, %v66_v12  ;;  %405 = vmatprep.subr.mxu0 %v511_v2  ;;  %324 = vst.msk [vmem:[#allocation9] sm:$0x1] %vm308_vm2, %v63_v15  ;;  %v312_v38 = vstv %s363_s14  ;;  %p484_p12 = scmp.lt.s32.totalorder %s482_s17, %s478_s16 }
  0x2c   :  { %403 = vmatmul.mubr.msk.f32.vlgmr.msra.gmra.mxu1 %vm79_vm1, %v63_v15  ;;  %406 = vmatpush3.msra.mxu0 %v230_v14 }
  0x2d   :  { %407 = vmatprep.subr.mxu0 %v511_v2  ;;  %413 = vmatprep.mubr.msk.f32.mxu0 %vm512_vm0, %v511_v2  ;;  %p485_p13 = por %p484_p12, %p483_p11 }
  0x2e   :  { %408 = vmatpush3.msra.mxu0 %v229_v16  ;;  %334 = vrot.lane.b32.xlu1 %v333_v23, %s513_s9 }
  0x2f   :  { %409 = vmatprep.subr.mxu0 %v511_v2  ;;  %p486_p0 = pnand %p485_p13, %p479_p10 }
  0x30   :  { %410 = vmatpush3.msra.mxu0 %v228_v17 }
  0x31   :  { %411 = vmatprep.subr.mxu0 %v511_v2 }
  0x32   :  { %412 = vmatpush3.msra.mxu0 %v227_v18 }
  0x33   :  { %414 = vmatmul.mubr.msk.f32.vlgmr.msra.gmra.mxu0 %vm79_vm1, %v67_v19 }
  0xa0   :  { %v335_v42 = vpop.permute.xlu1 %334 }
  0xeb   :  { %v149_v24 = vpop.f32.mrf.mxu0 }
  0xec   :  { %v222_v25 = vpop.f32.mrf.mxu1 }
  0xed   :  { %v393_v26 = vpop.f32.mrf.mxu0  ;;  %v223_v28 = vadd.f32 %v222_v25, %v149_v24 }
  0xee   :  { %v404_v27 = vpop.f32.mrf.mxu1 }
  0xf3   :  { %v300_v30 = vpop.f32.mrf.mxu0 }
  0xf4   :  { %v304_v31 = vadd.f32 %v300_v30, %v223_v28 }
  0xf5   :  { %v415_v32 = vpop.f32.mrf.mxu0 }
  0xf6   :  { %v305_v33 = vadd.f32 %v304_v31, %v68_v29 }
  0xf8   :  { %v306_v35 = vmax.f32 %v305_v33, 0.0 }
  0xfa   :  { %v307_v36 = vmul.f32 %v306_v35, %v69_v34 }
  0xfc   :  { %v309_v37 = vsel %vm308_vm2, %v307_v36, 0.0 }
  0xfd   :  { %310 = vadd.xlane.f32.xlu0 %v309_v37 }
 0x113   :  { %325 = vrot.lane.b32.xlu0 %v66_v12, %s514_s13 }
 0x186   :  { %v311_v39 = vpop.xlane.xlu0 %310 }
 0x187   :  { %v313_v40 = vadd.f32 %v312_v38, %v311_v39 }
 0x189   :  { %v314_v41 = vsub.f32 0.0, %v313_v40  ;;  %vm320_vm6 = vcmp.gt.f32.partialorder %v313_v40, 0.0 }
 0x18a   :  { %v326_v43 = vpop.permute.xlu0 %325  ;;  %v367_v48 = vsel %vm320_vm6, 1.0, %v511_v2 }
 0x18b   :  { %v315_v44 = vmul.f32 1.442695, %v314_v41  ;;  %329 = vst.msk [vmem:[#allocation9] sm:$0x1] %vm328_vm3, %v326_v43 }
 0x18c   :  { %338 = vst.msk [vmem:[#allocation9] sm:$0x1] %vm337_vm4, %v335_v42 }
 0x18d   :  { %426 = vpow2.f32 %v315_v44  ;;  %340 = vst.msk [vmem:[#allocation9] sm:$0x1] %vm339_vm5, %v313_v40 }
 0x19a   :  { %v427_v45 = vpop.eup %426 }
 0x19b   :  { %v317_v46 = vadd.f32 1.0, %v427_v45 }
 0x19d   :  { %428 = vrcp.f32 %v317_v46 }
 0x1aa   :  { %v429_v47 = vpop.eup %428 }
 0x1ab   :  { %342 = vst.msk [vmem:[#allocation9] sm:$0x1] %vm341_vm7, %v429_v47 }
 0x1ac   :  { %344 = vst.msk [vmem:[#allocation9] sm:$0x1] %vm343_vm8, %v367_v48 }
 0x1ad   :  { %489 = shalt.err (!%p486_p0)
}
 0x1ae   :  { %354 = dma.vmem_to_hbm [thread:$0]  %s352_s15, 16, %s597_s5, [#allocation4]  }
 0x1af   :  { %504 = dma.done.wait [#allocation4], 16  }
 0x1b0   :  { %505 = vsyncadd [#allocation4], 4294967280 }
 0x1b1   :  { %358 = vsyncpa [#allocation3], 1 }
 0x1b2   :  { %359 = vsyncpa [#allocation8], 1 }
 0x1b3   :  { %360 = vsyncpa [#allocation4], 1 }
 0x1b4   :  { %361 = vsyncpa [#allocation5], 1 }

</bundles_post_ra>
